<compile_context>
chip_gen: v7x
topology: tpu7x:2x2x1
jax: 0.10.0
libtpu: 0.0.40
codegen_flags: <defaults>
</compile_context>

<pallas_src>
import functools

import jax
import jax.numpy as jnp
from jax.experimental import pallas as pl
from jax.experimental.pallas import tpu as pltpu

_OUT_W = 128          # lane-dense packed output width
_PAD_DIST = 1e30      # ||v||^2 for padded vertices (guaranteed to lose the row-min)


def _round_up(a, m):
    return (a + m - 1) // m * m


# ----------------------------------------------------------------------------
# Kernel 1: weights-only path.
#   dd     = p @ vt_fold            (== ||v||^2 - 2 p.v, since p lane 3 is 1.0)
#   onehot = (dd <= row_min)        (exact ties would sum tied weight rows)
#   w      = onehot @ waug          (one-hot gather on the MXU)
#   d2     = row_min + ||p||^2  -> lane 127 of the packed output slab
# ----------------------------------------------------------------------------
def _weights_kernel(pts_ref, vt_ref, waug_ref, out_ref):
    p = pts_ref[...]                                               # [tn, 8]
    dd = jnp.dot(p, vt_ref[...], preferred_element_type=jnp.float32)   # [tn, Vp]
    row_min = jnp.min(dd, axis=-1, keepdims=True)                  # [tn, 1]
    onehot = (dd <= row_min).astype(jnp.float32)                   # [tn, Vp]
    w_full = jnp.dot(onehot, waug_ref[...],
                     preferred_element_type=jnp.float32)           # [tn, 128]
    p2 = jnp.sum(p * p, axis=-1, keepdims=True) - 1.0              # ||x||^2
    d2 = jnp.maximum(row_min + p2, 0.0)                            # [tn, 1]
    col = jax.lax.broadcasted_iota(jnp.int32, (1, _OUT_W), 1)
    out_ref[...] = w_full + d2 * (col == _OUT_W - 1).astype(jnp.float32)


# ----------------------------------------------------------------------------
# Kernel 2: skin path (forward LBS).
#   [dd | x_tile] = p @ [vt_fold | tilex]   (single MXU push, K = 8)
#   w_rep  = onehot @ wrep_aug              (pre-repeated weights -> no repw matmul)
#   skin   = (w_rep * x_tile) @ taug        (cols [0,4) hold the homogeneous point)
#   d2 -> lane 4 of the packed output slab
# ----------------------------------------------------------------------------
def _skin_kernel(pts_ref, comb_ref, wrep_ref, taug_ref, out_ref, *, vp):
    p = pts_ref[...]                                               # [tn, 8]
    big = jnp.dot(p, comb_ref[...], preferred_element_type=jnp.float32)  # [tn, Vp+128]
    dd = big[:, :vp]                                               # [tn, Vp]
    x_tile = big[:, vp:]                                           # [tn, 128]
    row_min = jnp.min(dd, axis=-1, keepdims=True)                  # [tn, 1]
    onehot = (dd <= row_min).astype(jnp.float32)                   # [tn, Vp]
    w_rep = jnp.dot(onehot, wrep_ref[...],
                    preferred_element_type=jnp.float32)            # [tn, 128]
    skin = jnp.dot(w_rep * x_tile, taug_ref[...],
                   preferred_element_type=jnp.float32)             # [tn, 128]
    p2 = jnp.sum(p * p, axis=-1, keepdims=True) - 1.0
    d2 = jnp.maximum(row_min + p2, 0.0)
    col = jax.lax.broadcasted_iota(jnp.int32, (1, _OUT_W), 1)
    out_ref[...] = skin + d2 * (col == 4).astype(jnp.float32)


# ----------------------------------------------------------------------------
# Tiling / padding helpers
# ----------------------------------------------------------------------------
def _pick_tile(n, vp, tn_max=1024):
    # Cap so one [tn, Vp] f32 temporary stays <= ~4 MiB (v7x-safe for SMPL-sized V).
    cap = max(128, ((1 << 20) // max(vp, 128)) // 8 * 8)
    # Prefer >= 2 grid steps so v7x's second TensorCore is not idle.
    half = _round_up(max((n + 1) // 2, 8), 8)
    return max(8, min(tn_max, cap, half))


def _pad_points(x, tn):
    """x [N,3] -> [Npad, 8] rows [x, y, z, 1, 0, 0, 0, 0]; pad rows all-zero."""
    n = x.shape[0]
    npad = _round_up(n, tn)
    xh8 = jnp.concatenate(
        [x.astype(jnp.float32),
         jnp.ones((n, 1), jnp.float32),
         jnp.zeros((n, 4), jnp.float32)], axis=-1)
    return jnp.pad(xh8, ((0, npad - n), (0, 0))), npad


_COMPILER_PARAMS = pltpu.CompilerParams(
    dimension_semantics=("parallel",),
    vmem_limit_bytes=48 * 1024 * 1024)   # leaves headroom on v7x (64 MiB physical)


def deform_weights(x, vt_fold, w_aug, *, num_joints, tn_max=1024):
    """Weights-only fused path. x [N,3] -> (weights [N,J], d2 [N])."""
    n = x.shape[0]
    vp = vt_fold.shape[1]
    tn = _pick_tile(n, vp, tn_max)
    xh8, npad = _pad_points(x, tn)
    packed = pl.pallas_call(
        _weights_kernel,
        out_shape=jax.ShapeDtypeStruct((npad, _OUT_W), jnp.float32),
        grid_spec=pltpu.PrefetchScalarGridSpec(
            num_scalar_prefetch=0,
            grid=(npad // tn,),
            in_specs=[
                pl.BlockSpec((tn, 8), lambda i: (i, 0)),           # points
                pl.BlockSpec((8, vp), lambda i: (0, 0)),           # folded verts (resident)
                pl.BlockSpec((vp, _OUT_W), lambda i: (0, 0)),      # skin weights (resident)
            ],
            out_specs=pl.BlockSpec((tn, _OUT_W), lambda i: (i, 0))),
        compiler_params=_COMPILER_PARAMS,
    )(xh8, vt_fold, w_aug)
    return packed[:n, :num_joints], packed[:n, _OUT_W - 1]


def deform_skin(x, comb, wrep_aug, t_aug, *, tn_max=1024):
    """Skin-only fused path. x [N,3] -> (skinned [N,3], d2 [N])."""
    n = x.shape[0]
    vp = comb.shape[1] - _OUT_W
    tn = _pick_tile(n, vp, tn_max)
    xh8, npad = _pad_points(x, tn)
    packed = pl.pallas_call(
        functools.partial(_skin_kernel, vp=vp),
        out_shape=jax.ShapeDtypeStruct((npad, _OUT_W), jnp.float32),
        grid_spec=pltpu.PrefetchScalarGridSpec(
            num_scalar_prefetch=0,
            grid=(npad // tn,),
            in_specs=[
                pl.BlockSpec((tn, 8), lambda i: (i, 0)),                 # points
                pl.BlockSpec((8, vp + _OUT_W), lambda i: (0, 0)),        # [verts | tilex]
                pl.BlockSpec((vp, _OUT_W), lambda i: (0, 0)),            # repeated weights
                pl.BlockSpec((_OUT_W, _OUT_W), lambda i: (0, 0)),        # tfs rearranged
            ],
            out_specs=pl.BlockSpec((tn, _OUT_W), lambda i: (i, 0))),
        compiler_params=_COMPILER_PARAMS,
    )(xh8, comb, wrep_aug, t_aug)
    return packed[:n, :3], packed[:n, 4]


# ----------------------------------------------------------------------------
# Grid-invariant operand preparation (done once in the wrapper, not per tile).
# ----------------------------------------------------------------------------
def _prep_verts_folded(verts):
    """verts [V,3] -> vt_fold [8, Vp]: rows 0-2 = -2*v^T, row 3 = ||v||^2.
    p @ vt_fold == ||v||^2 - 2 p.v since points carry 1.0 in lane 3.
    Padded vertices get ||v||^2 = 1e30 so they can never win the row-min."""
    v, _ = verts.shape
    vp = _round_up(v, 128)
    verts = verts.astype(jnp.float32)
    m2v = jnp.pad(-2.0 * verts, ((0, vp - v), (0, 0))).T           # [3, Vp]
    v2 = jnp.sum(verts * verts, axis=-1)
    v2 = jnp.pad(v2, (0, vp - v), constant_values=_PAD_DIST)[None, :]
    return jnp.concatenate([m2v, v2, jnp.zeros((4, vp), jnp.float32)], axis=0)


def _prep_weights(w):
    """w [V, J] -> [Vp, 128] zero-padded (rows to Vp, lanes to 128)."""
    v, j = w.shape
    vp = _round_up(v, 128)
    return jnp.pad(w.astype(jnp.float32), ((0, vp - v), (0, _OUT_W - j)))


def _prep_wrep(w):
    """w [V, J] -> [Vp, 128]: column 4n+k (k<4) holds w[:, n], zero beyond 4J.
    Precomputed (weights @ repeat-matrix) so the in-kernel repw matmul is gone."""
    v, j = w.shape
    vp = _round_up(v, 128)
    wrep = jnp.repeat(w.astype(jnp.float32), 4, axis=1)            # [V, 4J]
    return jnp.pad(wrep, ((0, vp - v), (0, _OUT_W - 4 * j)))


def _prep_tilex(j):
    """[8, 128]: M[k, 4n+k] = 1 (k<4, n<J) -> (p @ M)[p, 4n+k] = xh[p, k]."""
    rows = jnp.arange(8)[:, None]
    cols = jnp.arange(_OUT_W)[None, :]
    return jnp.where((cols % 4 == rows) & (cols < 4 * j), 1.0, 0.0).astype(jnp.float32)


def _prep_comb(verts, j):
    """[8, Vp+128] = [vt_fold | tilex]: distance + x-tiling share one MXU push."""
    return jnp.concatenate([_prep_verts_folded(verts), _prep_tilex(j)], axis=1)


def _prep_tfs(tfs, j):
    """tfs [J,4,4] -> taug [128, 128]: row 4n+k holds tfs[n, :, k] at cols [0,4)."""
    tfs_r = jnp.transpose(tfs.astype(jnp.float32), (0, 2, 1)).reshape(4 * j, 4)
    return jnp.pad(tfs_r, ((0, _OUT_W - 4 * j), (0, _OUT_W - 4)))


# ----------------------------------------------------------------------------
# SMPLDeformer (forward semantics of the PyTorch module, K = 1)
# ----------------------------------------------------------------------------
class SMPLDeformer:
    """JAX/Pallas port of the PyTorch SMPLDeformer forward pass (K = 1).
    The SMPL server / checkpoint load is replaced by deterministic synthetic
    canonical vertices + skinning weights (no file IO)."""

    def __init__(self, max_dist=0.1, K=1, num_verts=512, num_joints=24, seed=0):
        assert K == 1  # TODO(synk): K > 1 top-k selection not implemented in the kernel
        assert 4 * num_joints <= _OUT_W
        self.max_dist = max_dist
        self.K = K
        self.num_joints = num_joints
        key = jax.random.PRNGKey(seed)
        kv, kw = jax.random.split(key)
        self.smpl_verts = jax.random.normal(kv, (1, num_verts, 3), jnp.float32)
        logits = jax.random.normal(kw, (1, num_verts, num_joints), jnp.float32)
        self.smpl_weights = jax.nn.softmax(logits, axis=-1)       # rows sum to 1
        # Grid-invariant operands prepared once (not per tile / per call).
        self._vt_fold = _prep_verts_folded(self.smpl_verts[0])
        self._comb = _prep_comb(self.smpl_verts[0], num_joints)
        self._w_aug = _prep_weights(self.smpl_weights[0])
        self._wrep = _prep_wrep(self.smpl_weights[0])

    def _outlier(self, d2):
        # sqrt(clamp(d2, max=4)) > max_dist  <=>  min(d2, 4) > max_dist^2
        return jnp.minimum(d2, 4.0) > self.max_dist ** 2

    # -- API mirroring the PyTorch module ------------------------------------
    def query_skinning_weights_smpl_multi(self, pts, smpl_verts, smpl_weights):
        # pts: [1, N, 3]; smpl_verts: [V, 3]; smpl_weights: [1, V, J]
        vt_fold = _prep_verts_folded(smpl_verts)
        w_aug = _prep_weights(smpl_weights[0])
        weights, d2 = deform_weights(pts[0], vt_fold, w_aug,
                                     num_joints=self.num_joints)
        # K=1: exp(-d2)/sum(exp(-d2)) == 1, so the confidence weighting is a no-op.
        return weights[None], self._outlier(d2)

    def forward(self, x, smpl_tfs, return_weights=True, inverse=False,
                smpl_verts=None):
        if x.shape[0] == 0:
            return x          # matches the PyTorch module's early-return
        if return_weights:
            vt_fold = (self._vt_fold if smpl_verts is None
                       else _prep_verts_folded(smpl_verts[0]))
            weights, _ = deform_weights(x, vt_fold, self._w_aug,
                                        num_joints=self.num_joints)
            return weights[None]
        if inverse:
            # TODO(synk): inverse LBS (per-point 4x4 matrix inverse) not implemented.
            raise NotImplementedError("inverse skinning not implemented")
        comb = (self._comb if smpl_verts is None
                else _prep_comb(smpl_verts[0], self.num_joints))
        t_aug = _prep_tfs(smpl_tfs[0], self.num_joints)
        skinned, d2 = deform_skin(x, comb, self._wrep, t_aug)
        return skinned, self._outlier(d2)

    def forward_skinning(self, xc, cond, smpl_tfs):
        # xc: [1, N, 3] -> [1, N, 3]
        t_aug = _prep_tfs(smpl_tfs[0], self.num_joints)
        skinned, _ = deform_skin(xc[0], self._comb, self._wrep, t_aug)
        return skinned[None]

    def query_weights(self, xc):
        return self.forward(xc, None, return_weights=True, inverse=False)


# ----------------------------------------------------------------------------
# Pure-JAX reference (mirrors the PyTorch semantics) for a correctness check.
# ----------------------------------------------------------------------------
def _ref_weights(x, verts, smpl_weights, max_dist):
    d = jnp.sum((x[:, None, :] - verts[None, :, :]) ** 2, axis=-1)   # [N, V]
    idx = jnp.argmin(d, axis=-1)
    d2 = jnp.take_along_axis(d, idx[:, None], axis=-1)
    w = smpl_weights[0][idx]                                         # K=1 -> conf = 1
    return w[None], jnp.sqrt(jnp.minimum(d2, 4.0))[:, 0] > max_dist


def _ref_skin(x, w, tfs):
    xh = jnp.pad(x, ((0, 0), (0, 1)), constant_values=1.0)
    out = jnp.einsum('pn,nij,pj->pi', w, tfs, xh, precision='highest')
    return out[:, :3]


if __name__ == "__main__":
    N, V, J = 128, 512, 24
    deformer = SMPLDeformer(max_dist=0.1, K=1, num_verts=V, num_joints=J, seed=0)

    key = jax.random.PRNGKey(0)
    kx, kt = jax.random.split(key)
    x = 0.5 * jax.random.normal(kx, (N, 3), jnp.float32)

    # Synthetic bone transforms: random affine with last row [0,0,0,1].
    top = 0.1 * jax.random.normal(kt, (J, 3, 4), jnp.float32) + jnp.pad(
        jnp.eye(3, dtype=jnp.float32), ((0, 0), (0, 1)))[None]
    bottom = jnp.tile(jnp.array([[0.0, 0.0, 0.0, 1.0]], jnp.float32)[None],
                      (J, 1, 1))
    smpl_tfs = jnp.concatenate([top, bottom], axis=1)[None]          # [1, J, 4, 4]

    # Weights path (weights-only specialized kernel).
    weights = jax.block_until_ready(
        deformer.forward(x, smpl_tfs, return_weights=True))

    # Skinning path (skin-specialized kernel).
    x_t, mask = deformer.forward(x, smpl_tfs, return_weights=False, inverse=False)
    x_t = jax.block_until_ready(x_t)
    mask = jax.block_until_ready(mask)

    # forward_skinning path.
    x_fs = jax.block_until_ready(deformer.forward_skinning(x[None], None, smpl_tfs))

    # Correctness checks against the pure-JAX reference.
    w_ref, mask_ref = _ref_weights(x, deformer.smpl_verts[0],
                                   deformer.smpl_weights, deformer.max_dist)
    x_ref = _ref_skin(x, w_ref[0], smpl_tfs[0])

    assert weights.shape == (1, N, J) and x_t.shape == (N, 3) and mask.shape == (N,)
    assert x_fs.shape == (1, N, 3)
    assert jnp.allclose(weights, w_ref, rtol=1e-4, atol=1e-5)
    assert bool(jnp.all(mask == mask_ref))
    assert jnp.allclose(x_t, x_ref, rtol=1e-4, atol=1e-4)
    assert jnp.allclose(x_fs[0], x_t, rtol=1e-5, atol=1e-6)

    print("KERNEL_OK")
</pallas_src>

<mosaic_0001>
module attributes {stable_mosaic.version = 11 : i64} {
  func.func @_weights_kernel(%arg0: i32, %arg1: memref<64x8xf32, #tpu.memory_space<vmem>>, %arg2: memref<8x512xf32, #tpu.memory_space<vmem>>, %arg3: memref<512x128xf32, #tpu.memory_space<vmem>>, %arg4: memref<64x128xf32, #tpu.memory_space<vmem>>) attributes {dimension_semantics = [#tpu.dimension_semantics<parallel>], iteration_bounds = array<i64: 2>, scalar_prefetch = 0 : i64, scratch_operands = 0 : i64, tpu.core_type = #tpu.core_type<tc>, window_params = [{transform_indices = @transform_0, window_bounds = array<i64: 64, 8>}, {pipeline_mode = #tpu.pipeline_mode<synchronous>, transform_indices = @transform_1, window_bounds = array<i64: 8, 512>}, {pipeline_mode = #tpu.pipeline_mode<synchronous>, transform_indices = @transform_2, window_bounds = array<i64: 512, 128>}, {transform_indices = @transform_3, window_bounds = array<i64: 64, 128>}]} {
    %c0 = arith.constant 0 : index
    %c0_0 = arith.constant 0 : index
    %0 = vector.load %arg1[%c0, %c0_0] : memref<64x8xf32, #tpu.memory_space<vmem>>, vector<64x8xf32>
    %c0_1 = arith.constant 0 : index
    %c0_2 = arith.constant 0 : index
    %1 = vector.load %arg2[%c0_1, %c0_2] : memref<8x512xf32, #tpu.memory_space<vmem>>, vector<8x512xf32>
    %cst = arith.constant dense<0.000000e+00> : vector<64x512xf32>
    %2 = tpu.matmul %0, %1, %cst {dimension_numbers = #tpu.dot_dimension_numbers<[1], [0], [0], [1], [0, 0, 1, 1], [], []>} : vector<64x8xf32>, vector<8x512xf32>, vector<64x512xf32> -> vector<64x512xf32>
    %cst_3 = arith.constant dense<0x7F800000> : vector<64xf32>
    %3 = vector.multi_reduction <minimumf>, %2, %cst_3 [1] : vector<64x512xf32> to vector<64xf32>
    %4 = vector.shape_cast %3 : vector<64xf32> to vector<64x1xf32>
    %5 = vector.broadcast %4 : vector<64x1xf32> to vector<64x512xf32>
    %6 = arith.cmpf ole, %2, %5 : vector<64x512xf32>
    %7 = arith.extui %6 : vector<64x512xi1> to vector<64x512xi32>
    %8 = arith.sitofp %7 : vector<64x512xi32> to vector<64x512xf32>
    %c0_4 = arith.constant 0 : index
    %c0_5 = arith.constant 0 : index
    %9 = vector.load %arg3[%c0_4, %c0_5] : memref<512x128xf32, #tpu.memory_space<vmem>>, vector<512x128xf32>
    %cst_6 = arith.constant dense<0.000000e+00> : vector<64x128xf32>
    %10 = tpu.matmul %8, %9, %cst_6 {dimension_numbers = #tpu.dot_dimension_numbers<[1], [0], [0], [1], [0, 0, 1, 1], [], []>} : vector<64x512xf32>, vector<512x128xf32>, vector<64x128xf32> -> vector<64x128xf32>
    %11 = arith.mulf %0, %0 : vector<64x8xf32>
    %cst_7 = arith.constant dense<0.000000e+00> : vector<64xf32>
    %12 = vector.multi_reduction <add>, %11, %cst_7 [1] : vector<64x8xf32> to vector<64xf32>
    %13 = vector.shape_cast %12 : vector<64xf32> to vector<64x1xf32>
    %cst_8 = arith.constant 1.000000e+00 : f32
    %14 = vector.broadcast %cst_8 : f32 to vector<64x1xf32>
    %15 = arith.subf %13, %14 : vector<64x1xf32>
    %16 = arith.addf %4, %15 : vector<64x1xf32>
    %cst_9 = arith.constant 0.000000e+00 : f32
    %17 = vector.broadcast %cst_9 : f32 to vector<64x1xf32>
    %18 = arith.maximumf %16, %17 : vector<64x1xf32>
    %19 = tpu.iota {dimensions = array<i32: 1>} : vector<1x128xi32>
    %c127_i32 = arith.constant 127 : i32
    %20 = vector.broadcast %c127_i32 : i32 to vector<1x128xi32>
    %21 = arith.cmpi eq, %19, %20 : vector<1x128xi32>
    %22 = arith.extui %21 : vector<1x128xi1> to vector<1x128xi32>
    %23 = arith.sitofp %22 : vector<1x128xi32> to vector<1x128xf32>
    %24 = vector.broadcast %18 : vector<64x1xf32> to vector<64x128xf32>
    %25 = vector.broadcast %23 : vector<1x128xf32> to vector<64x128xf32>
    %26 = arith.mulf %24, %25 : vector<64x128xf32>
    %27 = arith.addf %10, %26 : vector<64x128xf32>
    %c0_10 = arith.constant 0 : index
    %c0_11 = arith.constant 0 : index
    %28 = vector.load %arg4[%c0_10, %c0_11] : memref<64x128xf32, #tpu.memory_space<vmem>>, vector<64x128xf32>
    tpu.vector_store %arg4[%c0_10, %c0_11], %27 {strides = array<i32>} : memref<64x128xf32, #tpu.memory_space<vmem>>, vector<64x128xf32>,
    return
  }
  func.func @transform_0(%arg0: i32) -> (i32, i32) {
    %c0_i32 = arith.constant 0 : i32
    %c0_i32_0 = arith.constant 0 : i32
    return %arg0, %c0_i32 : i32, i32
  }
  func.func @transform_1(%arg0: i32) -> (i32, i32) {
    %c0_i32 = arith.constant 0 : i32
    %c0_i32_0 = arith.constant 0 : i32
    %c0_i32_1 = arith.constant 0 : i32
    return %c0_i32, %c0_i32_0 : i32, i32
  }
  func.func @transform_2(%arg0: i32) -> (i32, i32) {
    %c0_i32 = arith.constant 0 : i32
    %c0_i32_0 = arith.constant 0 : i32
    %c0_i32_1 = arith.constant 0 : i32
    return %c0_i32, %c0_i32_0 : i32, i32
  }
  func.func @transform_3(%arg0: i32) -> (i32, i32) {
    %c0_i32 = arith.constant 0 : i32
    %c0_i32_0 = arith.constant 0 : i32
    return %arg0, %c0_i32 : i32, i32
  }
}

</mosaic_0001>

<bundles_post_ra>
// kernel: tpu_custom_call.1
= control target key start
LH: loop header
LB: loop body
LE: loop exit
PB: predicated region body
PF: predicated region fallthrough
CT: control target
= control target key end

     0   :  { %8 = vsyncpa [#allocation3], 0  ;;  %s1974_s0 = inlined_call_operand.vmem [shape: f32[128,8], index: 0, kind: input, shape index: {}]   ;;  %s1975_s1 = inlined_call_operand.vmem [shape: f32[8,512], index: 1, kind: input, shape index: {}]   ;;  %s1976_s2 = inlined_call_operand.hbm [shape: f32[512,128], index: 2, kind: input, shape index: {}]   ;;  %s1977_s3 = inlined_call_operand.hbm [shape: f32[128,128], index: 3, kind: output, shape index: {}]  }
   0x1   :  { %9 = vsyncpa [#allocation4], 0 }
   0x2   :  { %11 = vsyncpa [#allocation4 + $0x1], 0  ;;  %s1485_s12 = smov 0   ;;  %s1487_s13 = smov 0  }
   0x3   :  { %s1489_s14 = smov 0   ;;  %s1491_s15 = smov 0  }
   0x4 LB: > { %s1506_s16 = sadd.s32 4294967295, %s1455_s15   ;;  %s1025_s17 = sadd.s32 4294967294, %s1455_s15   ;;  %s1455_s15 = sphi %s1491_s15, %s1993_s15   ;;  %s1451_s14 = sphi %s1489_s14, %s1992_s14   ;;  %s1447_s13 = sphi %s1487_s13, %s1991_s13   ;;  %s1443_s12 = sphi %s1485_s12, %s1990_s12  }
   0x5   : > { %s1510_s18 = sadd.s32 1, %s1455_s15   ;;  %s92_s19 = sadd.s32 1, %s1451_s14 }
   0x6   : > { %s89_s20 = ssub.s32 %s1455_s15, %s1510_s18  ;;  %p102_p0 = scmp.ne.s32.totalorder %s1451_s14, %s1447_s13 }
   0x7   : > { %p90_p1 = scmp.eq.s32.totalorder %s89_s20, 0  ;;  %p103_p2 = scmp.eq.s32.totalorder %s1506_s16, 1 }
   0x8   : > { %p108_p3 = scmp.ne.s32.totalorder %s1447_s13, %s1443_s12  ;;  %p109_p4 = scmp.eq.s32.totalorder %s1025_s17, 1 }
   0x9   : > { %s1521_s21 = scalar_select %p90_p1, %s1451_s14, %s92_s19  }
   0xa   : > { %p1523_p5 = por %p103_p2, %p102_p0  ;;  %p1527_p6 = por %p109_p4, %p108_p3 }
   0xb   : > { %p1026_p7 = scmp.ge.s32.totalorder %s1455_s15, 1  ;;  %p116_p8 = scmp.lt.s32.totalorder %s1455_s15, 3 }
   0xc   : > { %s1981_s22 = scalar_select %p1523_p5, 1, 0 }
   0xd   : > { %s1982_s23 = scalar_select %p1527_p6, 1, 0 }
   0xe   : > { %p1978_p9 = scmp.eq.s32.totalorder %s1506_s16, 0  ;;  %p1534_p10 = pnand %p1026_p7, %p116_p8 }
   0xf   : > { %s1457_s25 = smov [#allocation2]   ;;  %s1361_s30 = scalar_lea.hbm %s1976_s2, 8192 }
  0x10   : > { %s1983_s24 = scalar_select %p1534_p10, 1, 0 }
  0x11   : > { %s131_s26 = sshll.u32 %s1457_s25, 4  ;;  %p1311_p11 = pneg %p1534_p10  ;;  %s132_s26 = int_to_ptr.vmem [resolvable:$true] %s131_s26 }
  0x12   : > { %p1362_p13 = scmp.ne.s32.totalorder %s1976_s2, %s1361_s30  ;;  %p1368_p3 = scmp.lt.u32.totalorder %s1361_s30, %s1976_s2 }
  0x13   : > { %p1542_p12 = pnand %p1978_p9, %p1311_p11 }
  0x15   : > { %p1363_p0 = pneg %p1542_p12 }
  0x17   : > { %p1364_p1 = pnand %p1363_p0, %p1362_p13 }
  0x19   : > { %p1365_p2 = pneg %p1364_p1 }
  0x1b   : > { %p1370_p4 = pnand %p1368_p3, %p1365_p2 }
  0x1d   : > { %1373 = shalt.err (!%p1370_p4)
}
  0x1e   : > { %s1374_s8 = scalar_lea.vmem %s132_s26, 8192  ;;  %p1382_p9 = scmp.lt.s32.totalorder %s132_s26, %s132_s26 }
  0x1f   : > { %p1375_p7 = scmp.ne.s32.totalorder %s132_s26, %s1374_s8  ;;  %p1383_p6 = scmp.lt.s32.totalorder %s1374_s8, %s1374_s8 }
  0x21   : > { %p1377_p8 = pnand %p1375_p7, %p1363_p0  ;;  %p1384_p5 = por %p1383_p6, %p1382_p9 }
  0x23   : > { %p1378_p11 = pneg %p1377_p8 }
  0x25   : > { %p1385_p10 = pnand %p1384_p5, %p1378_p11 }
  0x27   : > { %1388 = shalt.err (!%p1385_p10)
}
  0x28   : > { %s1458_s9 = smov 128   ;;  %s1459_s10 = smov 8  }
  0x29   : > { %1314 = dma.hbm_to_vmem [thread:$0]  (!%p1542_p12), %s1976_s2, 8192, %s132_s26, [#allocation3], %s1458_s9, %s1458_s9, %s1459_s10  }
  0x2a   : > { %p1985_p13 = scmp.ne.s32.totalorder %s1983_s24, 0 }
  0x2b   : > { %p1986_p1 = scmp.eq.s32.totalorder (!%p1985_p13), %s1506_s16, 0 }
  0x2c   : > { %156 = sbr.rel (%p1985_p13) target bundleno = 684 (0x2ac), region = 32 }
  0x33   : > { %1434 = dma.done.wait (%p1986_p1), [#allocation3], 8192   ;;  %p1987_p0 = pmov %p1986_p1 }
  0x34   : > { %s1032_s19 = sshll.u32 %s1506_s16, 3  ;;  %v1460_v0 = vmov 0.0   ;;  %v196_v1 = vld [vmem:[%s1975_s1 + $0x8] sm:$0xff]  ;;  %v195_v2 = vld [vmem:[%s1975_s1] sm:$0xff]  ;;  %vm199_vm0 = vcmask 64512   ;;  %v198_v4 = vld [vmem:[%s1975_s1 + $0x18] sm:$0xff] }
  0x35   : > { %1436 = vsyncadd (%p1987_p0), [#allocation3], 4294959104  ;;  %288 = vmatprep.mubr.f32.mxu0 %v1460_v0  ;;  %p181_p5 = scmp.lt.s32.totalorder %s1032_s19, 15  ;;  %401 = vmatprep.mubr.f32.mxu1 %v1460_v0  ;;  %v197_v5 = vld [vmem:[%s1975_s1 + $0x10] sm:$0xff]  ;;  %v602_v13 = vld [vmem:[#allocation2 + $0x80] sm:$0xff]  ;;  %s177_s8 = sand.u32 1, %s1447_s13  }
  0x36   : > { %224 = vmatprep.subr.mxu0 %v196_v1  ;;  %337 = vmatprep.subr.mxu1 %v198_v4  ;;  %v603_v14 = vld [vmem:[#allocation2 + $0x88] sm:$0xff]  ;;  %v586_v15 = vld [vmem:[#allocation2] sm:$0xff]  ;;  %v604_v24 = vld [vmem:[#allocation2 + $0x90] sm:$0xff]  ;;  %s1031_s9 = sshll.u32 %s177_s8, 6  ;;  %s1128_s17 = sshll.u32 %s1506_s16, 10 }
  0x37   : > { %s1995_s19 = smov (!%p181_p5, %s1032_s19), 15  ;;  %225 = vmatpush1.msra.mxu0 %v195_v2  ;;  %338 = vmatpush1.msra.mxu1 %v197_v5  ;;  %v1241_v16 = vpack.c.bf16 %v603_v14, %v602_v13  ;;  %v587_v17 = vld [vmem:[#allocation2 + $0x8] sm:$0xff]  ;;  %v634_v18 = vld [vmem:[#allocation2 + $0x180] sm:$0xff]  ;;  %v605_v26 = vld [vmem:[#allocation2 + $0x98] sm:$0xff]  ;;  %s1902_s10 = scalar_lea.vmem [#allocation5], %s1031_s9 }
  0x38   : > { %s1033_s20 = sshll.u32 %s1995_s19, 3  ;;  %v635_v19 = vld [vmem:[#allocation2 + $0x188] sm:$0xff]  ;;  %v1243_v20 = vpack.c.bf16 %v587_v17, %v586_v15  ;;  %v618_v22 = vld [vmem:[#allocation2 + $0x100] sm:$0xff]  ;;  %v588_v27 = vld [vmem:[#allocation2 + $0x10] sm:$0xff]  ;;  %v1245_v29 = vpack.c.bf16 %v605_v26, %v604_v24  ;;  %s951_s11 = sshll.u32 %s1902_s10, 4  ;;  %s1923_s11 = int_to_ptr.vmem [resolvable:$true] %s951_s11 }
  0x39   : > { %s1574_s24 = scalar_lea.vmem %s1974_s0, %s1033_s20  ;;  %v1273_v21 = vpack.c.bf16 %v635_v19, %v634_v18  ;;  %v619_v23 = vld [vmem:[#allocation2 + $0x108] sm:$0xff]  ;;  %1242 = vmatprep.subr.bf16.mxu0 %v1241_v16  ;;  %v589_v28 = vld [vmem:[#allocation2 + $0x18] sm:$0xff]  ;;  %v636_v31 = vld [vmem:[#allocation2 + $0x190] sm:$0xff]  ;;  %s1928_s25 = scalar_lea.hbm %s1977_s3, %s1128_s17 }
  0x3a   : > { %v1583_v3 = vld [vmem:[%s1574_s24] sm:$0xff]  ;;  %v1597_v6 = vld [vmem:[%s1574_s24 + $0x8] sm:$0xff]  ;;  %v1606_v7 = vld [vmem:[%s1574_s24 + $0x10] sm:$0xff]  ;;  %v1275_v25 = vpack.c.bf16 %v619_v23, %v618_v22  ;;  %v1247_v30 = vpack.c.bf16 %v589_v28, %v588_v27  ;;  %s1933_s26 = scalar_lea.sflag [#allocation4], %s177_s8  ;;  %p1988_p9 = scmp.ne.s32.totalorder %s1981_s22, 0 }
  0x3b   : > { %1034 = vmatmul.mubr.msk.f32.vlgmr.msra.gmra.mrb[0].mxu0 %vm199_vm0, %v1583_v3  ;;  %1042 = vmatmul.mubr.msk.f32.vlgmr.msra.gmra.mrb[0].mxu1 %vm199_vm0, %v1583_v3  ;;  %v1615_v8 = vld [vmem:[%s1574_s24 + $0x18] sm:$0xff]  ;;  %v1624_v9 = vld [vmem:[%s1574_s24 + $0x20] sm:$0xff]  ;;  %v1633_v10 = vld [vmem:[%s1574_s24 + $0x28] sm:$0xff]  ;;  %s1462_s16 = smov [#allocation5]  }
  0x3c   : > { %294 = vmatprep.mubr.f32.mxu0 %v1460_v0  ;;  %407 = vmatprep.mubr.f32.mxu1 %v1460_v0  ;;  %v1642_v11 = vld [vmem:[%s1574_s24 + $0x30] sm:$0xff]  ;;  %v1651_v12 = vld [vmem:[%s1574_s24 + $0x38] sm:$0xff]  ;;  %v606_v36 = vld [vmem:[#allocation2 + $0xa0] sm:$0xff]  ;;  %s1389_s24 = scalar_lea.vmem %s1923_s11, 1024  ;;  %s1393_s27 = sshll.u32 %s1462_s16, 4  ;;  %s1394_s27 = int_to_ptr.vmem [resolvable:$false] %s1393_s27 }
  0x3d   : > { %1244 = vmatpush3.bf16.msra.mxu0 %v1243_v20  ;;  %1274 = vmatprep.subr.bf16.mxu1 %v1273_v21  ;;  %v637_v32 = vld [vmem:[#allocation2 + $0x198] sm:$0xff]  ;;  %v620_v33 = vld [vmem:[#allocation2 + $0x110] sm:$0xff]  ;;  %v607_v37 = vld [vmem:[#allocation2 + $0xa8] sm:$0xff]  ;;  %p1390_p6 = scmp.ne.s32.totalorder %s1923_s11, %s1389_s24  ;;  %s1395_s28 = scalar_lea.vmem %s1394_s27, 2048 }
  0x3e   : > { %1276 = vmatpush3.bf16.msra.mxu1 %v1275_v25  ;;  %v1277_v34 = vpack.c.bf16 %v637_v32, %v636_v31  ;;  %v621_v35 = vld [vmem:[#allocation2 + $0x118] sm:$0xff]  ;;  %1246 = vmatprep.subr.bf16.mxu0 %v1245_v29  ;;  %v1249_v39 = vpack.c.bf16 %v607_v37, %v606_v36  ;;  %v590_v40 = vld [vmem:[#allocation2 + $0x20] sm:$0xff]  ;;  %v591_v41 = vld [vmem:[#allocation2 + $0x28] sm:$0xff]  ;;  %p1396_p2 = scmp.lt.s32.totalorder %s1923_s11, %s1394_s27  ;;  %p1397_p3 = scmp.lt.s32.totalorder %s1395_s28, %s1389_s24 }
  0x3f   : > { %1035 = vmatmul.mubr.msk.f32.gmra.mrb[2].mxu0 %vm199_vm0, %v1597_v6  ;;  %1043 = vmatmul.mubr.msk.f32.gmra.mrb[2].mxu1 %vm199_vm0, %v1597_v6  ;;  %v1279_v38 = vpack.c.bf16 %v621_v35, %v620_v33  ;;  %v638_v42 = vld [vmem:[#allocation2 + $0x1a0] sm:$0xff]  ;;  %v639_v43 = vld [vmem:[#allocation2 + $0x1a8] sm:$0xff]  ;;  %v1251_v46 = vpack.c.bf16 %v591_v41, %v590_v40  ;;  %v608_v48 = vld [vmem:[#allocation2 + $0xb0] sm:$0xff]  ;;  %p1391_p10 = pnand %p1390_p6, %p1988_p9 }
  0x40   : > { %300 = vmatprep.mubr.f32.mxu0 %v1460_v0  ;;  %413 = vmatprep.mubr.f32.mxu1 %v1460_v0  ;;  %v622_v44 = vld [vmem:[#allocation2 + $0x120] sm:$0xff]  ;;  %v623_v45 = vld [vmem:[#allocation2 + $0x128] sm:$0xff]  ;;  %v1281_v47 = vpack.c.bf16 %v639_v43, %v638_v42  ;;  %v609_v49 = vld [vmem:[#allocation2 + $0xb8] sm:$0xff]  ;;  %p1398_p4 = por %p1397_p3, %p1396_p2 }
  0x41   : > { %1278 = vmatprep.subr.bf16.mxu1 %v1277_v34  ;;  %1248 = vmatpush3.bf16.msra.mxu0 %v1247_v30  ;;  %v592_v50 = vld [vmem:[#allocation2 + $0x30] sm:$0xff]  ;;  %v1283_v51 = vpack.c.bf16 %v623_v45, %v622_v44  ;;  %v1253_v52 = vpack.c.bf16 %v609_v49, %v608_v48  ;;  %v593_v53 = vld [vmem:[#allocation2 + $0x38] sm:$0xff]  ;;  %v610_v59 = vld [vmem:[#allocation2 + $0xc0] sm:$0xff]  ;;  %p1392_p12 = pneg %p1391_p10 }
  0x42   : > { %1280 = vmatpush3.bf16.msra.mxu1 %v1279_v38  ;;  %1250 = vmatprep.subr.bf16.mxu0 %v1249_v39  ;;  %v640_v54 = vld [vmem:[#allocation2 + $0x1b0] sm:$0xff]  ;;  %v641_v55 = vld [vmem:[#allocation2 + $0x1b8] sm:$0xff]  ;;  %v611_v60 = vld [vmem:[#allocation2 + $0xc8] sm:$0xff]  ;;  %v1255_v61 = vpack.c.bf16 %v593_v53, %v592_v50 }
  0x43   : > { %1036 = vmatmul.mubr.msk.f32.gmra.mrb[4].mxu0 %vm199_vm0, %v1606_v7  ;;  %1044 = vmatmul.mubr.msk.f32.gmra.mrb[4].mxu1 %vm199_vm0, %v1606_v7  ;;  %v1285_v56 = vpack.c.bf16 %v641_v55, %v640_v54  ;;  %v624_v57 = vld [vmem:[#allocation2 + $0x130] sm:$0xff]  ;;  %v625_v58 = vld [vmem:[#allocation2 + $0x138] sm:$0xff]  ;;  %v642_v62 = vld [vmem:[#allocation2 + $0x1c0] sm:$0xff]  ;;  %v1257_v2 = vpack.c.bf16 %v611_v60, %v610_v59  ;;  %p1399_p7 = pnand %p1398_p4, %p1392_p12 }
  0x44   : > { %306 = vmatprep.mubr.f32.mxu0 %v1460_v0  ;;  %419 = vmatprep.mubr.f32.mxu1 %v1460_v0  ;;  %v643_v63 = vld [vmem:[#allocation2 + $0x1c8] sm:$0xff]  ;;  %v1287_v1 = vpack.c.bf16 %v625_v58, %v624_v57  ;;  %v594_v4 = vld [vmem:[#allocation2 + $0x40] sm:$0xff]  ;;  %v612_v16 = vld [vmem:[#allocation2 + $0xd0] sm:$0xff] }
  0x45   : > { %1282 = vmatprep.subr.bf16.mxu1 %v1281_v47  ;;  %1252 = vmatpush3.bf16.msra.mxu0 %v1251_v46  ;;  %v595_v5 = vld [vmem:[#allocation2 + $0x48] sm:$0xff]  ;;  %v626_v13 = vld [vmem:[#allocation2 + $0x140] sm:$0xff]  ;;  %v1289_v14 = vpack.c.bf16 %v643_v63, %v642_v62  ;;  %v613_v17 = vld [vmem:[#allocation2 + $0xd8] sm:$0xff] }
  0x46   : > { %1284 = vmatpush3.bf16.msra.mxu1 %v1283_v51  ;;  %1254 = vmatprep.subr.bf16.mxu0 %v1253_v52  ;;  %v627_v15 = vld [vmem:[#allocation2 + $0x148] sm:$0xff]  ;;  %v644_v18 = vld [vmem:[#allocation2 + $0x1d0] sm:$0xff]  ;;  %v645_v19 = vld [vmem:[#allocation2 + $0x1d8] sm:$0xff]  ;;  %v1259_v20 = vpack.c.bf16 %v595_v5, %v594_v4  ;;  %v1261_v22 = vpack.c.bf16 %v613_v17, %v612_v16 }
  0x47   : > { %1037 = vmatmul.mubr.msk.f32.gmra.mrb[6].mxu0 %vm199_vm0, %v1615_v8  ;;  %1045 = vmatmul.mubr.msk.f32.gmra.mrb[6].mxu1 %vm199_vm0, %v1615_v8  ;;  %v1291_v21 = vpack.c.bf16 %v627_v15, %v626_v13  ;;  %v596_v23 = vld [vmem:[#allocation2 + $0x50] sm:$0xff]  ;;  %v597_v24 = vld [vmem:[#allocation2 + $0x58] sm:$0xff]  ;;  %v1293_v26 = vpack.c.bf16 %v645_v19, %v644_v18  ;;  %v614_v28 = vld [vmem:[#allocation2 + $0xe0] sm:$0xff] }
  0x48   : > { %312 = vmatprep.mubr.f32.mxu0 %v1460_v0  ;;  %425 = vmatprep.mubr.f32.mxu1 %v1460_v0  ;;  %v628_v25 = vld [vmem:[#allocation2 + $0x150] sm:$0xff]  ;;  %v629_v27 = vld [vmem:[#allocation2 + $0x158] sm:$0xff]  ;;  %v615_v29 = vld [vmem:[#allocation2 + $0xe8] sm:$0xff]  ;;  %v1263_v32 = vpack.c.bf16 %v597_v24, %v596_v23 }
  0x49   : > { %1286 = vmatprep.subr.bf16.mxu1 %v1285_v56  ;;  %1256 = vmatpush3.bf16.msra.mxu0 %v1255_v61  ;;  %v646_v30 = vld [vmem:[#allocation2 + $0x1e0] sm:$0xff]  ;;  %v647_v31 = vld [vmem:[#allocation2 + $0x1e8] sm:$0xff]  ;;  %v1295_v33 = vpack.c.bf16 %v629_v27, %v628_v25  ;;  %v1265_v34 = vpack.c.bf16 %v615_v29, %v614_v28  ;;  %v616_v40 = vld [vmem:[#allocation2 + $0xf0] sm:$0xff] }
  0x4a   : > { %1288 = vmatpush3.bf16.msra.mxu1 %v1287_v1  ;;  %1258 = vmatprep.subr.bf16.mxu0 %v1257_v2  ;;  %v598_v35 = vld [vmem:[#allocation2 + $0x60] sm:$0xff]  ;;  %v599_v36 = vld [vmem:[#allocation2 + $0x68] sm:$0xff]  ;;  %v1297_v38 = vpack.c.bf16 %v647_v31, %v646_v30  ;;  %v617_v41 = vld [vmem:[#allocation2 + $0xf8] sm:$0xff] }
  0x4b   : > { %1038 = vmatmul.mubr.msk.f32.gmra.mrb[8].mxu0 %vm199_vm0, %v1624_v9  ;;  %1046 = vmatmul.mubr.msk.f32.gmra.mrb[8].mxu1 %vm199_vm0, %v1624_v9  ;;  %v630_v37 = vld [vmem:[#allocation2 + $0x160] sm:$0xff]  ;;  %v631_v39 = vld [vmem:[#allocation2 + $0x168] sm:$0xff]  ;;  %v648_v42 = vld [vmem:[#allocation2 + $0x1f0] sm:$0xff]  ;;  %v1267_v44 = vpack.c.bf16 %v599_v36, %v598_v35  ;;  %v1269_v46 = vpack.c.bf16 %v617_v41, %v616_v40 }
  0x4c   : > { %318 = vmatprep.mubr.f32.mxu0 %v1460_v0  ;;  %431 = vmatprep.mubr.f32.mxu1 %v1460_v0  ;;  %v649_v43 = vld [vmem:[#allocation2 + $0x1f8] sm:$0xff]  ;;  %v1299_v45 = vpack.c.bf16 %v631_v39, %v630_v37  ;;  %v600_v47 = vld [vmem:[#allocation2 + $0x70] sm:$0xff] }
  0x4d   : > { %1290 = vmatprep.subr.bf16.mxu1 %v1289_v14  ;;  %1260 = vmatpush3.bf16.msra.mxu0 %v1259_v20  ;;  %v601_v48 = vld [vmem:[#allocation2 + $0x78] sm:$0xff]  ;;  %v1301_v49 = vpack.c.bf16 %v649_v43, %v648_v42  ;;  %v632_v50 = vld [vmem:[#allocation2 + $0x170] sm:$0xff] }
  0x4e   : > { %1292 = vmatpush3.bf16.msra.mxu1 %v1291_v21  ;;  %1262 = vmatprep.subr.bf16.mxu0 %v1261_v22  ;;  %v633_v51 = vld [vmem:[#allocation2 + $0x178] sm:$0xff]  ;;  %v1271_v52 = vpack.c.bf16 %v601_v48, %v600_v47 }
  0x4f   : > { %1039 = vmatmul.mubr.msk.f32.gmra.mrb[10].mxu0 %vm199_vm0, %v1633_v10  ;;  %1047 = vmatmul.mubr.msk.f32.gmra.mrb[10].mxu1 %vm199_vm0, %v1633_v10  ;;  %v1303_v53 = vpack.c.bf16 %v633_v51, %v632_v50  ;;  %v650_v50 = vmul.f32 %v1583_v3, %v1583_v3 }
  0x50   : > { %324 = vmatprep.mubr.f32.mxu0 %v1460_v0  ;;  %437 = vmatprep.mubr.f32.mxu1 %v1460_v0 }
  0x51   : > { %1294 = vmatprep.subr.bf16.mxu1 %v1293_v26  ;;  %1264 = vmatpush3.bf16.msra.mxu0 %v1263_v32 }
  0x52   : > { %1296 = vmatpush3.bf16.msra.mxu1 %v1295_v33  ;;  %1266 = vmatprep.subr.bf16.mxu0 %v1265_v34 }
  0x53   : > { %1040 = vmatmul.mubr.msk.f32.gmra.mrb[12].mxu0 %vm199_vm0, %v1642_v11  ;;  %1048 = vmatmul.mubr.msk.f32.gmra.mrb[12].mxu1 %vm199_vm0, %v1642_v11 }
  0x54   : > { %330 = vmatprep.mubr.f32.mxu0 %v1460_v0  ;;  %443 = vmatprep.mubr.f32.mxu1 %v1460_v0 }
  0x55   : > { %1298 = vmatprep.subr.bf16.mxu1 %v1297_v38  ;;  %1268 = vmatpush3.bf16.msra.mxu0 %v1267_v44 }
  0x56   : > { %1300 = vmatpush3.bf16.msra.mxu1 %v1299_v45  ;;  %1270 = vmatprep.subr.bf16.mxu0 %v1269_v46 }
  0x57   : > { %1041 = vmatmul.mubr.msk.f32.gmra.mrb[14].mxu0 %vm199_vm0, %v1651_v12  ;;  %1049 = vmatmul.mubr.msk.f32.gmra.mrb[14].mxu1 %vm199_vm0, %v1651_v12 }
  0x58   : > { %1302 = vmatprep.subr.bf16.mxu1 %v1301_v49 }
  0x59   : > { %1272 = vmatpush3.bf16.msra.mxu0 %v1271_v52 }
  0x5a   : > { %1304 = vmatpush3.bf16.msra.mxu1 %v1303_v53 }
 0x10e   : > { %v1658_v54 = vpop.f32.mrb[0].mxu0  ;;  %v1662_v56 = vpop.f32.mrb[0].mxu1 }
 0x10f   : > { %v1660_v55 = vpop.f32.mrb[1].mxu0  ;;  %v1666_v58 = vpop.f32.mrb[1].mxu1 }
 0x110   : > { %v450_v57 = vmin.f32 %v1658_v54, %v1660_v55 }
 0x112   : > { %v451_v59 = vmin.f32 %v450_v57, %v1662_v56  ;;  %v1669_v60 = vpop.f32.mrb[2].mxu0  ;;  %v1673_v62 = vpop.f32.mrb[2].mxu1 }
 0x113   : > { %v1671_v61 = vpop.f32.mrb[3].mxu0  ;;  %v1677_v1 = vpop.f32.mrb[3].mxu1 }
 0x114   : > { %v455_v63 = vmin.f32 %v1669_v60, %v1671_v61  ;;  %v452_v2 = vmin.f32 %v451_v59, %v1666_v58  ;;  %v658_v59 = vsel %vm199_vm0, %v650_v50, 0.0 }
 0x116   : > { %v456_v4 = vmin.f32 %v455_v63, %v1673_v62  ;;  %453 = vmin.xlane.f32.xlu0 %v452_v2  ;;  %v1681_v5 = vpop.f32.mrb[4].mxu0  ;;  %v1685_v14 = vpop.f32.mrb[4].mxu1  ;;  %v652_v63 = vmul.f32 %v1606_v7, %v1606_v7  ;;  %v651_v2 = vmul.f32 %v1597_v6, %v1597_v6 }
 0x117   : > { %v1683_v13 = vpop.f32.mrb[5].mxu0  ;;  %v1689_v16 = vpop.f32.mrb[5].mxu1 }
 0x118   : > { %v460_v15 = vmin.f32 %v1681_v5, %v1683_v13  ;;  %v457_v17 = vmin.f32 %v456_v4, %v1677_v1  ;;  %v664_v4 = vsel %vm199_vm0, %v652_v63, 0.0 }
 0x11a   : > { %v461_v18 = vmin.f32 %v460_v15, %v1685_v14  ;;  %458 = vmin.xlane.f32.xlu0 %v457_v17  ;;  %v1693_v19 = vpop.f32.mrb[6].mxu0  ;;  %v1697_v21 = vpop.f32.mrb[6].mxu1  ;;  %v661_v15 = vsel %vm199_vm0, %v651_v2, 0.0  ;;  %v654_v17 = vmul.f32 %v1624_v9, %v1624_v9 }
 0x11b   : > { %v1695_v20 = vpop.f32.mrb[7].mxu0  ;;  %v1701_v23 = vpop.f32.mrb[7].mxu1 }
 0x11c   : > { %v465_v22 = vmin.f32 %v1693_v19, %v1695_v20  ;;  %v462_v24 = vmin.f32 %v461_v18, %v1689_v16  ;;  %v653_v18 = vmul.f32 %v1615_v8, %v1615_v8  ;;  %v670_v7 = vsel %vm199_vm0, %v654_v17, 0.0 }
 0x11d   : > { %v657_v8 = vmul.f32 %v1651_v12, %v1651_v12 }
 0x11e   : > { %v466_v25 = vmin.f32 %v465_v22, %v1697_v21  ;;  %463 = vmin.xlane.f32.xlu1 %v462_v24  ;;  %v1705_v26 = vpop.f32.mrb[8].mxu0  ;;  %v1709_v28 = vpop.f32.mrb[8].mxu1  ;;  %v667_v6 = vsel %vm199_vm0, %v653_v18, 0.0  ;;  %v656_v22 = vmul.f32 %v1642_v11, %v1642_v11  ;;  %v655_v24 = vmul.f32 %v1633_v10, %v1633_v10 }
 0x11f   : > { %v1707_v27 = vpop.f32.mrb[9].mxu0  ;;  %v1713_v30 = vpop.f32.mrb[9].mxu1  ;;  %v1461_v10 = vmov 1.0  }
 0x120   : > { %v470_v29 = vmin.f32 %v1705_v26, %v1707_v27  ;;  %v467_v31 = vmin.f32 %v466_v25, %v1701_v23  ;;  %v676_v25 = vsel %vm199_vm0, %v656_v22, 0.0  ;;  %v673_v9 = vsel %vm199_vm0, %v655_v24, 0.0 }
 0x122   : > { %v471_v32 = vmin.f32 %v470_v29, %v1709_v28  ;;  %468 = vmin.xlane.f32.xlu1 %v467_v31  ;;  %v1717_v33 = vpop.f32.mrb[10].mxu0  ;;  %v1721_v35 = vpop.f32.mrb[10].mxu1  ;;  %v679_v29 = vsel %vm199_vm0, %v657_v8, 0.0 }
 0x123   : > { %v1719_v34 = vpop.f32.mrb[11].mxu0  ;;  %v1725_v37 = vpop.f32.mrb[11].mxu1 }
 0x124   : > { %v475_v36 = vmin.f32 %v1717_v33, %v1719_v34  ;;  %v472_v38 = vmin.f32 %v471_v32, %v1713_v30 }
 0x126   : > { %v476_v39 = vmin.f32 %v475_v36, %v1721_v35  ;;  %473 = vmin.xlane.f32.xlu0 %v472_v38  ;;  %v1729_v40 = vpop.f32.mrb[12].mxu0  ;;  %v1733_v42 = vpop.f32.mrb[12].mxu1 }
 0x127   : > { %v1731_v41 = vpop.f32.mrb[13].mxu0  ;;  %v1737_v44 = vpop.f32.mrb[13].mxu1 }
 0x128   : > { %v480_v43 = vmin.f32 %v1729_v40, %v1731_v41  ;;  %v477_v45 = vmin.f32 %v476_v39, %v1725_v37 }
 0x12a   : > { %v481_v46 = vmin.f32 %v480_v43, %v1733_v42  ;;  %478 = vmin.xlane.f32.xlu1 %v477_v45  ;;  %v1741_v47 = vpop.f32.mrb[14].mxu0  ;;  %v1745_v49 = vpop.f32.mrb[14].mxu1 }
 0x12b   : > { %v1743_v48 = vpop.f32.mrb[15].mxu0  ;;  %v1751_v52 = vpop.f32.mrb[15].mxu1 }
 0x12c   : > { %v485_v51 = vmin.f32 %v1741_v47, %v1743_v48  ;;  %v482_v53 = vmin.f32 %v481_v46, %v1737_v44 }
 0x12e   : > { %v486_v57 = vmin.f32 %v485_v51, %v1745_v49  ;;  %483 = vmin.xlane.f32.xlu0 %v482_v53 }
 0x130   : > { %v487_v3 = vmin.f32 %v486_v57, %v1751_v52 }
 0x132   : > { %659 = vadd.xlane.f32.xlu0 %v658_v59  ;;  %488 = vmin.xlane.f32.xlu1 %v487_v3 }
 0x136   : > { %665 = vadd.xlane.f32.xlu0 %v664_v4  ;;  %662 = vadd.xlane.f32.xlu1 %v661_v15 }
 0x13a   : > { %671 = vadd.xlane.f32.xlu0 %v670_v7  ;;  %668 = vadd.xlane.f32.xlu1 %v667_v6 }
 0x13e   : > { %677 = vadd.xlane.f32.xlu0 %v676_v25  ;;  %674 = vadd.xlane.f32.xlu1 %v673_v9 }
 0x142   : > { %680 = vadd.xlane.f32.xlu1 %v679_v29 }
 0x1a3   : > { %v1778_v31 = vpop.xlane.xlu0 %453 }
 0x1a4   : > { %vm491_vm1 = vcmp.le.f32.partialorder %v1660_v55, %v1778_v31  ;;  %vm493_vm2 = vcmp.le.f32.partialorder %v1666_v58, %v1778_v31  ;;  %vm490_vm3 = vcmp.le.f32.partialorder %v1658_v54, %v1778_v31  ;;  %vm492_vm4 = vcmp.le.f32.partialorder %v1662_v56, %v1778_v31 }
 0x1a5   : > { %1091 = vmatprep.mubr.msk.f32.mxu0 %vm491_vm1, %v1461_v10  ;;  %1107 = vmatprep.mubr.msk.f32.mxu1 %vm493_vm2, %v1461_v10 }
 0x1a6   : > { %1092 = vmatmul.mubr.msk.f32.vlgmr.msra.gmra.mrb[16].mxu0 %vm490_vm3, %v1461_v10  ;;  %1108 = vmatmul.mubr.msk.f32.vlgmr.msra.gmra.mrb[16].mxu1 %vm492_vm4, %v1461_v10 }
 0x1a7   : > { %v1792_v11 = vpop.xlane.xlu0 %458 }
 0x1a8   : > { %vm495_vm5 = vcmp.le.f32.partialorder %v1671_v61, %v1792_v11  ;;  %vm497_vm6 = vcmp.le.f32.partialorder %v1677_v1, %v1792_v11  ;;  %vm494_vm7 = vcmp.le.f32.partialorder %v1669_v60, %v1792_v11  ;;  %vm496_vm8 = vcmp.le.f32.partialorder %v1673_v62, %v1792_v11 }
 0x1a9   : > { %1093 = vmatprep.mubr.msk.f32.mxu0 %vm495_vm5, %v1461_v10  ;;  %1109 = vmatprep.mubr.msk.f32.mxu1 %vm497_vm6, %v1461_v10  ;;  %v706_v62 = vlaneseq }
 0x1aa   : > { %1094 = vmatmul.mubr.msk.f32.gmra.mrb[18].mxu0 %vm494_vm7, %v1461_v10  ;;  %1110 = vmatmul.mubr.msk.f32.gmra.mrb[18].mxu1 %vm496_vm8, %v1461_v10 }
 0x1ab   : > { %v1806_v12 = vpop.xlane.xlu1 %463 }
 0x1ac   : > { %vm499_vm9 = vcmp.le.f32.partialorder %v1683_v13, %v1806_v12  ;;  %vm501_vm10 = vcmp.le.f32.partialorder %v1689_v16, %v1806_v12  ;;  %vm498_vm11 = vcmp.le.f32.partialorder %v1681_v5, %v1806_v12  ;;  %vm500_vm12 = vcmp.le.f32.partialorder %v1685_v14, %v1806_v12 }
 0x1ad   : > { %1095 = vmatprep.mubr.msk.f32.mxu0 %vm499_vm9, %v1461_v10  ;;  %1111 = vmatprep.mubr.msk.f32.mxu1 %vm501_vm10, %v1461_v10  ;;  %v707_v13 = vand.u32 127, %v706_v62 }
 0x1ae   : > { %1096 = vmatmul.mubr.msk.f32.gmra.mrb[20].mxu0 %vm498_vm11, %v1461_v10  ;;  %1112 = vmatmul.mubr.msk.f32.gmra.mrb[20].mxu1 %vm500_vm12, %v1461_v10 }
 0x1af   : > { %v1820_v54 = vpop.xlane.xlu1 %468 }
 0x1b0   : > { %vm503_vm13 = vcmp.le.f32.partialorder %v1695_v20, %v1820_v54  ;;  %vm505_vm14 = vcmp.le.f32.partialorder %v1701_v23, %v1820_v54  ;;  %vm502_vm15 = vcmp.le.f32.partialorder %v1693_v19, %v1820_v54  ;;  %vm504_vm0 = vcmp.le.f32.partialorder %v1697_v21, %v1820_v54 }
 0x1b1   : > { %1097 = vmatprep.mubr.msk.f32.mxu0 %vm503_vm13, %v1461_v10  ;;  %1113 = vmatprep.mubr.msk.f32.mxu1 %vm505_vm14, %v1461_v10 }
 0x1b2   : > { %1098 = vmatmul.mubr.msk.f32.gmra.mrb[22].mxu0 %vm502_vm15, %v1461_v10  ;;  %1114 = vmatmul.mubr.msk.f32.gmra.mrb[22].mxu1 %vm504_vm0, %v1461_v10 }
 0x1b3   : > { %v1834_v55 = vpop.xlane.xlu0 %473 }
 0x1b4   : > { %vm507_vm1 = vcmp.le.f32.partialorder %v1707_v27, %v1834_v55  ;;  %vm509_vm2 = vcmp.le.f32.partialorder %v1713_v30, %v1834_v55  ;;  %vm506_vm3 = vcmp.le.f32.partialorder %v1705_v26, %v1834_v55  ;;  %vm508_vm4 = vcmp.le.f32.partialorder %v1709_v28, %v1834_v55 }
 0x1b5   : > { %1099 = vmatprep.mubr.msk.f32.mxu0 %vm507_vm1, %v1461_v10  ;;  %1115 = vmatprep.mubr.msk.f32.mxu1 %vm509_vm2, %v1461_v10  ;;  %vm708_vm1 = vcmp.eq.s32.totalorder %v707_v13, 127 }
 0x1b6   : > { %1100 = vmatmul.mubr.msk.f32.gmra.mrb[24].mxu0 %vm506_vm3, %v1461_v10  ;;  %1116 = vmatmul.mubr.msk.f32.gmra.mrb[24].mxu1 %vm508_vm4, %v1461_v10  ;;  %v1893_v27 = vsel %vm708_vm1, 1.0, %v1460_v0 }
 0x1b7   : > { %v1848_v56 = vpop.xlane.xlu1 %478 }
 0x1b8   : > { %vm511_vm5 = vcmp.le.f32.partialorder %v1719_v34, %v1848_v56  ;;  %vm513_vm6 = vcmp.le.f32.partialorder %v1725_v37, %v1848_v56  ;;  %vm510_vm7 = vcmp.le.f32.partialorder %v1717_v33, %v1848_v56  ;;  %vm512_vm8 = vcmp.le.f32.partialorder %v1721_v35, %v1848_v56 }
 0x1b9   : > { %1101 = vmatprep.mubr.msk.f32.mxu0 %vm511_vm5, %v1461_v10  ;;  %1117 = vmatprep.mubr.msk.f32.mxu1 %vm513_vm6, %v1461_v10 }
 0x1ba   : > { %1102 = vmatmul.mubr.msk.f32.gmra.mrb[26].mxu0 %vm510_vm7, %v1461_v10  ;;  %1118 = vmatmul.mubr.msk.f32.gmra.mrb[26].mxu1 %vm512_vm8, %v1461_v10 }
 0x1bb   : > { %v1862_v58 = vpop.xlane.xlu0 %483 }
 0x1bc   : > { %vm515_vm9 = vcmp.le.f32.partialorder %v1731_v41, %v1862_v58  ;;  %vm517_vm10 = vcmp.le.f32.partialorder %v1737_v44, %v1862_v58  ;;  %vm514_vm11 = vcmp.le.f32.partialorder %v1729_v40, %v1862_v58  ;;  %vm516_vm12 = vcmp.le.f32.partialorder %v1733_v42, %v1862_v58 }
 0x1bd   : > { %1103 = vmatprep.mubr.msk.f32.mxu0 %vm515_vm9, %v1461_v10  ;;  %1119 = vmatprep.mubr.msk.f32.mxu1 %vm517_vm10, %v1461_v10 }
 0x1be   : > { %1104 = vmatmul.mubr.msk.f32.gmra.mrb[28].mxu0 %vm514_vm11, %v1461_v10  ;;  %1120 = vmatmul.mubr.msk.f32.gmra.mrb[28].mxu1 %vm516_vm12, %v1461_v10 }
 0x1bf   : > { %v1876_v60 = vpop.xlane.xlu1 %488  ;;  %v660_v61 = vpop.xlane.xlu0 %659 }
 0x1c0   : > { %vm519_vm13 = vcmp.le.f32.partialorder %v1743_v48, %v1876_v60  ;;  %vm521_vm14 = vcmp.le.f32.partialorder %v1751_v52, %v1876_v60  ;;  %vm518_vm15 = vcmp.le.f32.partialorder %v1741_v47, %v1876_v60  ;;  %vm520_vm0 = vcmp.le.f32.partialorder %v1745_v49, %v1876_v60 }
 0x1c1   : > { %1105 = vmatprep.mubr.msk.f32.mxu0 %vm519_vm13, %v1461_v10  ;;  %1121 = vmatprep.mubr.msk.f32.mxu1 %vm521_vm14, %v1461_v10  ;;  %v1082_v1 = vadd.f32 -1.0, %v660_v61 }
 0x1c2   : > { %1106 = vmatmul.mubr.msk.f32.gmra.mrb[30].mxu0 %vm518_vm15, %v1461_v10  ;;  %1122 = vmatmul.mubr.msk.f32.gmra.mrb[30].mxu1 %vm520_vm0, %v1461_v10 }
 0x1c3   : > { %v663_v5 = vpop.xlane.xlu1 %662  ;;  %v690_v14 = vadd.f32 %v1082_v1, %v1778_v31  ;;  %v666_v16 = vpop.xlane.xlu0 %665 }
 0x1c4   : > { %v1083_v19 = vadd.f32 -1.0, %v663_v5  ;;  %v1084_v20 = vadd.f32 -1.0, %v666_v16 }
 0x1c5   : > { %v698_v21 = vmax.f32 %v690_v14, 0.0 }
 0x1c6   : > { %v691_v23 = vadd.f32 %v1083_v19, %v1792_v11  ;;  %v692_v32 = vadd.f32 %v1084_v20, %v1806_v12 }
 0x1c7   : > { %v669_v26 = vpop.xlane.xlu1 %668  ;;  %v672_v37 = vpop.xlane.xlu0 %671  ;;  %v711_v38 = vmul.f32 %v1893_v27, %v698_v21 }
 0x1c8   : > { %v1085_v33 = vadd.f32 -1.0, %v669_v26  ;;  %v699_v36 = vmax.f32 %v691_v23, 0.0  ;;  %v700_v43 = vmax.f32 %v692_v32, 0.0  ;;  %v1086_v44 = vadd.f32 -1.0, %v672_v37 }
 0x1ca   : > { %v693_v45 = vadd.f32 %v1085_v33, %v1820_v54  ;;  %v712_v50 = vmul.f32 %v1893_v27, %v699_v36  ;;  %v694_v63 = vadd.f32 %v1086_v44, %v1834_v55  ;;  %v713_v3 = vmul.f32 %v1893_v27, %v700_v43 }
 0x1cb   : > { %v675_v48 = vpop.xlane.xlu1 %674  ;;  %v678_v18 = vpop.xlane.xlu0 %677 }
 0x1cc   : > { %v1087_v2 = vadd.f32 -1.0, %v675_v48  ;;  %v701_v17 = vmax.f32 %v693_v45, 0.0  ;;  %v702_v8 = vmax.f32 %v694_v63, 0.0  ;;  %v1088_v29 = vadd.f32 -1.0, %v678_v18 }
 0x1ce   : > { %v695_v31 = vadd.f32 %v1087_v2, %v1848_v56  ;;  %v714_v55 = vmul.f32 %v1893_v27, %v701_v17  ;;  %v696_v14 = vadd.f32 %v1088_v29, %v1862_v58  ;;  %v715_v19 = vmul.f32 %v1893_v27, %v702_v8 }
 0x1cf   : > { %v681_v12 = vpop.xlane.xlu1 %680 }
 0x1d0   : > { %v1089_v16 = vadd.f32 -1.0, %v681_v12  ;;  %v703_v21 = vmax.f32 %v695_v31, 0.0 }
 0x279   : > { %v1161_v28 = vpop.f32.mrb[16].mxu0  ;;  %v1217_v30 = vpop.f32.mrb[16].mxu1 }
 0x27a   : > { %v1162_v34 = vpop.f32.mrb[17].mxu0  ;;  %v1218_v35 = vpop.f32.mrb[17].mxu1 }
 0x27b   : > { %v1163_v39 = vadd.f32 %v1162_v34, %v1161_v28  ;;  %v1219_v40 = vadd.f32 %v1218_v35, %v1217_v30  ;;  %v704_v34 = vmax.f32 %v696_v14, 0.0  ;;  %v697_v35 = vadd.f32 %v1089_v16, %v1876_v60 }
 0x27d   : > { %v786_v41 = vadd.f32 %v1163_v39, %v711_v38  ;;  %v1164_v42 = vpop.f32.mrb[18].mxu0  ;;  %v1220_v0 = vpop.f32.mrb[18].mxu1  ;;  %v716_v38 = vmul.f32 %v1893_v27, %v703_v21  ;;  %v717_v43 = vmul.f32 %v1893_v27, %v704_v34 }
 0x27e   : > { %v1165_v46 = vpop.f32.mrb[19].mxu0  ;;  %v1221_v47 = vpop.f32.mrb[19].mxu1 }
 0x27f   : > { %v891_v49 = vadd.f32 %v1219_v40, %v786_v41  ;;  %v1166_v51 = vadd.f32 %v1165_v46, %v1164_v42  ;;  %v1222_v52 = vadd.f32 %v1221_v47, %v1220_v0  ;;  %v705_v46 = vmax.f32 %v697_v35, 0.0 }
 0x281   : > { %929 = vst [vmem:[%s1902_s10] sm:$0xff] %v891_v49  ;;  %v791_v53 = vadd.f32 %v1166_v51, %v712_v50  ;;  %v1167_v57 = vpop.f32.mrb[20].mxu0  ;;  %v1223_v59 = vpop.f32.mrb[20].mxu1 }
 0x282   : > { %v1168_v4 = vpop.f32.mrb[21].mxu0  ;;  %v1224_v15 = vpop.f32.mrb[21].mxu1 }
 0x283   : > { %v896_v7 = vadd.f32 %v1222_v52, %v791_v53  ;;  %v1169_v6 = vadd.f32 %v1168_v4, %v1167_v57  ;;  %v1225_v22 = vadd.f32 %v1224_v15, %v1223_v59  ;;  %v718_v57 = vmul.f32 %v1893_v27, %v705_v46 }
 0x285   : > { %930 = vst [vmem:[%s1902_s10 + $0x8] sm:$0xff] %v896_v7  ;;  %v796_v24 = vadd.f32 %v1169_v6, %v713_v3  ;;  %v1170_v25 = vpop.f32.mrb[22].mxu0  ;;  %v1226_v9 = vpop.f32.mrb[22].mxu1 }
 0x286   : > { %v1171_v10 = vpop.f32.mrb[23].mxu0  ;;  %v1227_v11 = vpop.f32.mrb[23].mxu1 }
 0x287   : > { %v901_v54 = vadd.f32 %v1225_v22, %v796_v24  ;;  %v1172_v61 = vadd.f32 %v1171_v10, %v1170_v25  ;;  %v1228_v62 = vadd.f32 %v1227_v11, %v1226_v9 }
 0x289   : > { %931 = vst [vmem:[%s1902_s10 + $0x10] sm:$0xff] %v901_v54  ;;  %v801_v1 = vadd.f32 %v1172_v61, %v714_v55  ;;  %v1173_v5 = vpop.f32.mrb[24].mxu0  ;;  %v1229_v13 = vpop.f32.mrb[24].mxu1 }
 0x28a   : > { %v1174_v20 = vpop.f32.mrb[25].mxu0  ;;  %v1230_v56 = vpop.f32.mrb[25].mxu1 }
 0x28b   : > { %v906_v23 = vadd.f32 %v1228_v62, %v801_v1  ;;  %v1175_v26 = vadd.f32 %v1174_v20, %v1173_v5  ;;  %v1231_v28 = vadd.f32 %v1230_v56, %v1229_v13 }
 0x28d   : > { %932 = vst [vmem:[%s1902_s10 + $0x18] sm:$0xff] %v906_v23  ;;  %v806_v30 = vadd.f32 %v1175_v26, %v715_v19  ;;  %v1176_v32 = vpop.f32.mrb[26].mxu0  ;;  %v1232_v33 = vpop.f32.mrb[26].mxu1 }
 0x28e   : > { %v1177_v36 = vpop.f32.mrb[27].mxu0  ;;  %v1233_v37 = vpop.f32.mrb[27].mxu1 }
 0x28f   : > { %v911_v58 = vadd.f32 %v1231_v28, %v806_v30  ;;  %v1178_v39 = vadd.f32 %v1177_v36, %v1176_v32  ;;  %v1234_v40 = vadd.f32 %v1233_v37, %v1232_v33 }
 0x291   : > { %933 = vst [vmem:[%s1902_s10 + $0x20] sm:$0xff] %v911_v58  ;;  %v811_v41 = vadd.f32 %v1178_v39, %v716_v38  ;;  %v1179_v42 = vpop.f32.mrb[28].mxu0  ;;  %v1235_v0 = vpop.f32.mrb[28].mxu1 }
 0x292   : > { %v1180_v44 = vpop.f32.mrb[29].mxu0  ;;  %v1236_v45 = vpop.f32.mrb[29].mxu1 }
 0x293   : > { %v916_v60 = vadd.f32 %v1234_v40, %v811_v41  ;;  %v1181_v47 = vadd.f32 %v1180_v44, %v1179_v42  ;;  %v1237_v48 = vadd.f32 %v1236_v45, %v1235_v0 }
 0x295   : > { %934 = vst [vmem:[%s1902_s10 + $0x28] sm:$0xff] %v916_v60  ;;  %v816_v49 = vadd.f32 %v1181_v47, %v717_v43  ;;  %v1182_v50 = vpop.f32.mrb[30].mxu0  ;;  %v1238_v51 = vpop.f32.mrb[30].mxu1 }
 0x296   : > { %v1183_v52 = vpop.f32.mrb[31].mxu0  ;;  %v1239_v53 = vpop.f32.mrb[31].mxu1 }
 0x297   : > { %v921_v59 = vadd.f32 %v1237_v48, %v816_v49  ;;  %v1184_v63 = vadd.f32 %v1183_v52, %v1182_v50  ;;  %v1240_v2 = vadd.f32 %v1239_v53, %v1238_v51 }
 0x299   : > { %935 = vst [vmem:[%s1902_s10 + $0x30] sm:$0xff] %v921_v59  ;;  %v821_v3 = vadd.f32 %v1184_v63, %v718_v57 }
 0x29b   : > { %v926_v4 = vadd.f32 %v1240_v2, %v821_v3 }
 0x29d   : > { %936 = vst [vmem:[%s1902_s10 + $0x38] sm:$0xff] %v926_v4 }
 0x29e   : > { %1402 = shalt.err (!%p1399_p7)
}
 0x29f   : > { %s1403_s29 = scalar_lea.hbm %s1928_s25, 1024  ;;  %s1407_s5 = scalar_lea.hbm %s1977_s3, 2048 }
 0x2a0   : > { %p1404_p8 = scmp.ne.s32.totalorder %s1928_s25, %s1403_s29  ;;  %p1408_p1 = scmp.lt.u32.totalorder %s1928_s25, %s1977_s3 }
 0x2a1   : > { %p1409_p0 = scmp.lt.u32.totalorder %s1407_s5, %s1403_s29  ;;  %p1411_p6 = scmp.lt.u32.totalorder %s1403_s29, %s1928_s25 }
 0x2a2   : > { %p1405_p11 = pnand %p1404_p8, %p1988_p9 }
 0x2a3   : > { %p1410_p5 = por %p1409_p0, %p1408_p1 }
 0x2a4   : > { %p1406_p13 = pneg %p1405_p11 }
 0x2a5   : > { %p1412_p10 = por %p1411_p6, %p1410_p5 }
 0x2a7   : > { %p1413_p12 = pnand %p1412_p10, %p1406_p13 }
 0x2a9   : > { %1416 = shalt.err (!%p1413_p12)
}
 0x2aa   : > { %s1463_s8 = smov 128   ;;  %s1464_s9 = smov 8  }
 0x2ab   : > { %1309 = dma.vmem_to_hbm [thread:$0]  (%p1988_p9), %s1923_s11, 1024, %s1928_s25, %s1933_s26, %s1463_s8, %s1463_s8, %s1464_s9  }
 0x2ac PF: > { %p1321_p2 = scmp.ge.s32.totalorder %s1455_s15, 2  ;;  %s966_s10 = sand.u32 1, %s1443_s12  }
 0x2ad   : > { %p1989_p3 = scmp.ne.s32.totalorder %s1982_s23, 0  ;;  %s967_s17 = scalar_lea.sflag [#allocation4], %s966_s10 }
 0x2af   : > { %p1316_p4 = pnand %p1321_p2, %p1989_p3 }
 0x2b1   : > { %1438 = dma.done.wait (!%p1316_p4), %s967_s17, 1024  }
 0x2b2   : > { %1440 = vsyncadd (!%p1316_p4), %s967_s17, 4294966272  ;;  %p14_p7 = scmp.ge.s32.totalorder %s1510_s18, 4   ;;  %s1990_s12 = smov %s1447_s13 }
 0x2b3   : > { %s1991_s13 = smov %s1451_s14  ;;  %s1992_s14 = smov %s1521_s21 }
 0x2b4   : > { %s1993_s15 = smov %s1510_s18  ;;  %16 = sbr.rel (!%p14_p7) target bundleno = 4 (0x4), region = 72 }
 0x2bb   :  { %972 = vsyncpa [#allocation3], 1 }
 0x2bc   :  { %974 = vsyncpa [#allocation3 + $0x1], 1 }
 0x2bd   :  { %975 = vsyncpa [#allocation4], 1 }
 0x2be   :  { %977 = vsyncpa [#allocation4 + $0x1], 1 }

</bundles_post_ra>
